<compile_context>
chip_gen: v7x
topology: tpu7x:2x2x1
jax: 0.10.0
libtpu: 0.0.40
codegen_flags: <defaults>
</compile_context>

<pallas_src>
import functools

import jax
import jax.numpy as jnp
from jax.experimental import pallas as pl
from jax.experimental.pallas import tpu as pltpu

HIDDEN = 1024
NUM_HEADS = 16
HEAD_DIM = HIDDEN // NUM_HEADS
HEADS_PER_BLOCK = 2                 # 2 * 64 = 128-lane-dense attention blocks
FFN = 4096
NUM_LAYERS = 2                      # TODO(synk): roberta-large has 24 layers; 2 synthetic layers keep demo small
VOCAB = 1000                        # synthetic vocab (no checkpoint load)
MAX_POS = 64
EPS = 1e-5
NEG_INF = -1e9


# ----------------------------------------------------------------------------
# Tiled matmul + bias (QKV projection), bf16 MXU operands, f32 accumulation
# ----------------------------------------------------------------------------
def _mm_bias_kernel(a_ref, w_ref, b_ref, o_ref, acc_ref):
    @pl.when(pl.program_id(2) == 0)
    def _():
        acc_ref[...] = jnp.zeros_like(acc_ref)

    acc_ref[...] += jnp.dot(a_ref[...].astype(jnp.bfloat16),
                            w_ref[...].astype(jnp.bfloat16),
                            preferred_element_type=jnp.float32)

    @pl.when(pl.program_id(2) == pl.num_programs(2) - 1)
    def _():
        o_ref[...] = (acc_ref[...] + b_ref[...]).astype(o_ref.dtype)


def matmul_bias(a, w, b, *, tm=256, tn=512, tk=512, out_dtype=jnp.float32):
    """a: (M, K) f32/bf16, w: (K, N) bf16, b: (N,) f32 -> (M, N) out_dtype."""
    M, K = a.shape
    _, N = w.shape
    tm, tn, tk = min(tm, M), min(tn, N), min(tk, K)
    assert M % tm == 0 and N % tn == 0 and K % tk == 0
    return pl.pallas_call(
        _mm_bias_kernel,
        out_shape=jax.ShapeDtypeStruct((M, N), out_dtype),
        grid=(M // tm, N // tn, K // tk),
        in_specs=[
            pl.BlockSpec((tm, tk), lambda i, j, k: (i, k)),
            pl.BlockSpec((tk, tn), lambda i, j, k: (k, j)),
            pl.BlockSpec((1, tn), lambda i, j, k: (0, j)),
        ],
        out_specs=pl.BlockSpec((tm, tn), lambda i, j, k: (i, j)),
        scratch_shapes=[pltpu.VMEM((tm, tn), jnp.float32)],
        compiler_params=pltpu.CompilerParams(
            dimension_semantics=("parallel", "parallel", "arbitrary")),
    )(a, w, b.reshape(1, N))


# ----------------------------------------------------------------------------
# Matmul + bias + residual add + LayerNorm fused epilogue (N block = full H)
# Used for the attention output projection (wo).
# ----------------------------------------------------------------------------
def _mm_add_ln_kernel(a_ref, w_ref, b_ref, r_ref, g_ref, bb_ref, o_ref, acc_ref):
    @pl.when(pl.program_id(1) == 0)
    def _():
        acc_ref[...] = jnp.zeros_like(acc_ref)

    acc_ref[...] += jnp.dot(a_ref[...].astype(jnp.bfloat16),
                            w_ref[...].astype(jnp.bfloat16),
                            preferred_element_type=jnp.float32)

    @pl.when(pl.program_id(1) == pl.num_programs(1) - 1)
    def _():
        x = acc_ref[...] + b_ref[...] + r_ref[...].astype(jnp.float32)
        mu = jnp.mean(x, axis=-1, keepdims=True)
        var = jnp.mean((x - mu) ** 2, axis=-1, keepdims=True)
        o_ref[...] = ((x - mu) * jax.lax.rsqrt(var + EPS)
                      * g_ref[...] + bb_ref[...]).astype(o_ref.dtype)


def matmul_bias_add_ln(a, w, b, res, g, beta, *, tm=256, tk=512):
    """LayerNorm(a @ w + b + res) over the last (H) dim; f32 output."""
    M, K = a.shape
    _, N = w.shape
    tm, tk = min(tm, M), min(tk, K)
    assert M % tm == 0 and K % tk == 0
    return pl.pallas_call(
        _mm_add_ln_kernel,
        out_shape=jax.ShapeDtypeStruct((M, N), jnp.float32),
        grid=(M // tm, K // tk),
        in_specs=[
            pl.BlockSpec((tm, tk), lambda i, k: (i, k)),
            pl.BlockSpec((tk, N), lambda i, k: (k, 0)),
            pl.BlockSpec((1, N), lambda i, k: (0, 0)),
            pl.BlockSpec((tm, N), lambda i, k: (i, 0)),
            pl.BlockSpec((1, N), lambda i, k: (0, 0)),
            pl.BlockSpec((1, N), lambda i, k: (0, 0)),
        ],
        out_specs=pl.BlockSpec((tm, N), lambda i, k: (i, 0)),
        scratch_shapes=[pltpu.VMEM((tm, N), jnp.float32)],
        compiler_params=pltpu.CompilerParams(
            dimension_semantics=("parallel", "arbitrary")),
    )(a, w, b.reshape(1, N), res, g.reshape(1, N), beta.reshape(1, N))


# ----------------------------------------------------------------------------
# Fully fused FFN: LayerNorm(gelu(x @ w1 + b1) @ w2 + b2 + x)
# FFN axis chunked as the reduction grid dim; no (M, FFN) HBM intermediate.
# x is both the matmul LHS and the residual (resident block across the reduction).
# ----------------------------------------------------------------------------
def _ffn_kernel(x_ref, w1_ref, b1_ref, w2_ref, b2_ref, g_ref, bb_ref, o_ref, acc_ref):
    @pl.when(pl.program_id(1) == 0)
    def _():
        acc_ref[...] = jnp.zeros_like(acc_ref)

    h = jnp.dot(x_ref[...].astype(jnp.bfloat16), w1_ref[...],
                preferred_element_type=jnp.float32) + b1_ref[...]
    # TODO(synk): HF roberta uses erf-gelu; tanh approximation used here.
    h = jax.nn.gelu(h, approximate=True)
    acc_ref[...] += jnp.dot(h.astype(jnp.bfloat16), w2_ref[...],
                            preferred_element_type=jnp.float32)

    @pl.when(pl.program_id(1) == pl.num_programs(1) - 1)
    def _():
        y = acc_ref[...] + b2_ref[...] + x_ref[...].astype(jnp.float32)
        mu = jnp.mean(y, axis=-1, keepdims=True)
        var = jnp.mean((y - mu) ** 2, axis=-1, keepdims=True)
        o_ref[...] = ((y - mu) * jax.lax.rsqrt(var + EPS)
                      * g_ref[...] + bb_ref[...]).astype(o_ref.dtype)


def ffn_fused(x, w1, b1, w2, b2, g, beta, *, tm=256, tf=512):
    """x: (M, H) f32, w1: (H, F) bf16, w2: (F, H) bf16 -> (M, H) f32."""
    M, H = x.shape
    F = w1.shape[1]
    tm, tf = min(tm, M), min(tf, F)
    assert M % tm == 0 and F % tf == 0
    return pl.pallas_call(
        _ffn_kernel,
        out_shape=jax.ShapeDtypeStruct((M, H), jnp.float32),
        grid=(M // tm, F // tf),
        in_specs=[
            pl.BlockSpec((tm, H), lambda i, j: (i, 0)),      # x (LHS + residual, resident)
            pl.BlockSpec((H, tf), lambda i, j: (0, j)),      # w1 chunk
            pl.BlockSpec((1, tf), lambda i, j: (0, j)),      # b1 chunk
            pl.BlockSpec((tf, H), lambda i, j: (j, 0)),      # w2 chunk
            pl.BlockSpec((1, H), lambda i, j: (0, 0)),       # b2
            pl.BlockSpec((1, H), lambda i, j: (0, 0)),       # ln gamma
            pl.BlockSpec((1, H), lambda i, j: (0, 0)),       # ln beta
        ],
        out_specs=pl.BlockSpec((tm, H), lambda i, j: (i, 0)),
        scratch_shapes=[pltpu.VMEM((tm, H), jnp.float32)],
        compiler_params=pltpu.CompilerParams(
            dimension_semantics=("parallel", "arbitrary")),
    )(x, w1, b1.reshape(1, F), w2, b2.reshape(1, H),
      g.reshape(1, H), beta.reshape(1, H))


# ----------------------------------------------------------------------------
# Row-tiled LayerNorm (embedding LN)
# ----------------------------------------------------------------------------
def _ln_kernel(x_ref, g_ref, b_ref, o_ref):
    x = x_ref[...]
    mu = jnp.mean(x, axis=-1, keepdims=True)
    var = jnp.mean((x - mu) ** 2, axis=-1, keepdims=True)
    o_ref[...] = (x - mu) * jax.lax.rsqrt(var + EPS) * g_ref[...] + b_ref[...]


def layer_norm(x, g, b, *, tm=512):
    M, H = x.shape
    tm = min(tm, M)
    assert M % tm == 0
    return pl.pallas_call(
        _ln_kernel,
        out_shape=jax.ShapeDtypeStruct((M, H), jnp.float32),
        grid=(M // tm,),
        in_specs=[
            pl.BlockSpec((tm, H), lambda i: (i, 0)),
            pl.BlockSpec((1, H), lambda i: (0, 0)),
            pl.BlockSpec((1, H), lambda i: (0, 0)),
        ],
        out_specs=pl.BlockSpec((tm, H), lambda i: (i, 0)),
        compiler_params=pltpu.CompilerParams(dimension_semantics=("parallel",)),
    )(x, g.reshape(1, H), b.reshape(1, H))


# ----------------------------------------------------------------------------
# Attention: head selection via index_map on the fused QKV buffer,
# 2 heads per grid step (128-lane-dense blocks), fp32 softmax, bf16 matmuls
# ----------------------------------------------------------------------------
def _attn_kernel(q_ref, k_ref, v_ref, bias_ref, o_ref, *, scale, hpb):
    bias = bias_ref[...]                                    # (1, S) f32
    outs = []
    for h in range(hpb):
        lo, hi = h * HEAD_DIM, (h + 1) * HEAD_DIM
        q = q_ref[:, lo:hi]                                 # (S, 64) bf16
        k = k_ref[:, lo:hi]
        v = v_ref[:, lo:hi]
        s = jax.lax.dot_general(
            q, k, (((1,), (1,)), ((), ())),
            preferred_element_type=jnp.float32) * scale     # (S, S) f32
        s = s + bias
        s = s - jnp.max(s, axis=-1, keepdims=True)
        p = jnp.exp(s)
        p = p * pl.reciprocal(jnp.sum(p, axis=-1, keepdims=True), approx=True)
        outs.append(jnp.dot(p.astype(jnp.bfloat16), v,
                            preferred_element_type=jnp.float32))
    o_ref[...] = jnp.concatenate(outs, axis=-1).astype(o_ref.dtype)


def attention(qkv, attn_bias):
    """qkv: (B, S, 3*H) bf16 with columns [Q|K|V]; attn_bias: (B, 1, S) f32."""
    B, S, _ = qkv.shape
    blk = HEADS_PER_BLOCK * HEAD_DIM                        # 128 lanes
    n_blk = NUM_HEADS // HEADS_PER_BLOCK
    kern = functools.partial(_attn_kernel,
                             scale=1.0 / float(HEAD_DIM) ** 0.5,
                             hpb=HEADS_PER_BLOCK)
    return pl.pallas_call(
        kern,
        out_shape=jax.ShapeDtypeStruct((B, S, HIDDEN), jnp.bfloat16),
        grid=(B, n_blk),
        in_specs=[
            pl.BlockSpec((None, S, blk), lambda b, j: (b, 0, j)),              # Q pair
            pl.BlockSpec((None, S, blk), lambda b, j: (b, 0, n_blk + j)),      # K pair
            pl.BlockSpec((None, S, blk), lambda b, j: (b, 0, 2 * n_blk + j)),  # V pair
            pl.BlockSpec((None, 1, S), lambda b, j: (b, 0, 0)),                # mask bias
        ],
        out_specs=pl.BlockSpec((None, S, blk), lambda b, j: (b, 0, j)),
        compiler_params=pltpu.CompilerParams(
            dimension_semantics=("parallel", "parallel")),
    )(qkv, qkv, qkv, attn_bias)


# ----------------------------------------------------------------------------
# Fused head: mean-pool over seq -> LayerNorm(1024) -> Linear(1024, 3)
# ----------------------------------------------------------------------------
def _head_kernel(h_ref, g_ref, b_ref, w_ref, wb_ref, o_ref):
    h = h_ref[...]                                   # (B, S, H)
    pooled = jnp.mean(h, axis=1)                     # includes padding, like torch.mean
    mu = jnp.mean(pooled, axis=-1, keepdims=True)
    var = jnp.mean((pooled - mu) ** 2, axis=-1, keepdims=True)
    normed = (pooled - mu) * jax.lax.rsqrt(var + EPS) * g_ref[...] + b_ref[...]
    o_ref[...] = jnp.dot(normed, w_ref[...],
                         preferred_element_type=jnp.float32) + wb_ref[...]


def head(hidden, g, b, w, wb):
    B, S, H = hidden.shape
    N = w.shape[1]
    return pl.pallas_call(
        _head_kernel,
        out_shape=jax.ShapeDtypeStruct((B, N), jnp.float32),
        grid=(1,),
        in_specs=[
            pl.BlockSpec((B, S, H), lambda i: (0, 0, 0)),
            pl.BlockSpec((1, H), lambda i: (0, 0)),
            pl.BlockSpec((1, H), lambda i: (0, 0)),
            pl.BlockSpec((H, N), lambda i: (0, 0)),
            pl.BlockSpec((1, N), lambda i: (0, 0)),
        ],
        out_specs=pl.BlockSpec((B, N), lambda i: (0, 0)),
    )(hidden, g.reshape(1, H), b.reshape(1, H), w, wb.reshape(1, N))


# ----------------------------------------------------------------------------
# Parameters (deterministic synthetic init; no checkpoint load)
# ----------------------------------------------------------------------------
def init_params(key):
    keys = iter(jax.random.split(key, 8 + NUM_LAYERS * 8))

    def nrm(shape, scale=0.02, dtype=jnp.float32):
        return (jax.random.normal(next(keys), shape, jnp.float32) * scale).astype(dtype)

    params = {
        "word_emb": nrm((VOCAB, HIDDEN)),
        "pos_emb": nrm((MAX_POS, HIDDEN)),
        "type_emb": nrm((2, HIDDEN)),
        "emb_ln_g": jnp.ones((HIDDEN,), jnp.float32),
        "emb_ln_b": jnp.zeros((HIDDEN,), jnp.float32),
        "layers": [],
        "ln_g": jnp.ones((HIDDEN,), jnp.float32),     # self.ln = nn.LayerNorm(1024)
        "ln_b": jnp.zeros((HIDDEN,), jnp.float32),
        "out_w": nrm((HIDDEN, 3)),                    # self.out = nn.Linear(1024, 3)
        "out_b": jnp.zeros((3,), jnp.float32),
    }
    for _ in range(NUM_LAYERS):
        params["layers"].append({
            # fused QKV projection: columns [Q | K | V], stored bf16 for MXU/HBM
            "w_qkv": nrm((HIDDEN, 3 * HIDDEN), dtype=jnp.bfloat16),
            "b_qkv": jnp.zeros((3 * HIDDEN,), jnp.float32),
            "wo": nrm((HIDDEN, HIDDEN), dtype=jnp.bfloat16),
            "bo": jnp.zeros((HIDDEN,), jnp.float32),
            "attn_ln_g": jnp.ones((HIDDEN,), jnp.float32),
            "attn_ln_b": jnp.zeros((HIDDEN,), jnp.float32),
            "w1": nrm((HIDDEN, FFN), dtype=jnp.bfloat16),
            "b1": jnp.zeros((FFN,), jnp.float32),
            "w2": nrm((FFN, HIDDEN), dtype=jnp.bfloat16),
            "b2": jnp.zeros((HIDDEN,), jnp.float32),
            "ffn_ln_g": jnp.ones((HIDDEN,), jnp.float32),
            "ffn_ln_b": jnp.zeros((HIDDEN,), jnp.float32),
        })
    return params


# ----------------------------------------------------------------------------
# Forward (mirrors FeedbackModel.forward)
# ----------------------------------------------------------------------------
def feedback_model_forward(params, ids, mask, token_type_ids):
    B, S = ids.shape
    maskf = mask.astype(jnp.float32)
    attn_bias = ((1.0 - maskf) * NEG_INF).reshape(B, 1, S)

    # Embeddings (gather is plain-JAX glue; LN is a Pallas kernel).
    x = (jnp.take(params["word_emb"], ids, axis=0)
         + jnp.take(params["pos_emb"], jnp.arange(S), axis=0)[None, :, :]
         + jnp.take(params["type_emb"], token_type_ids, axis=0))
    x2 = layer_norm(x.reshape(B * S, HIDDEN), params["emb_ln_g"], params["emb_ln_b"])

    for layer in params["layers"]:
        # fused Q/K/V projection -> (B*S, 3H) bf16
        qkv = matmul_bias(x2, layer["w_qkv"], layer["b_qkv"],
                          out_dtype=jnp.bfloat16)
        # attention reads heads directly out of qkv (no XLA transposes)
        ao = attention(qkv.reshape(B, S, 3 * HIDDEN), attn_bias)      # (B, S, H) bf16
        # output projection with fused residual add + LayerNorm
        x2 = matmul_bias_add_ln(ao.reshape(B * S, HIDDEN), layer["wo"], layer["bo"],
                                x2, layer["attn_ln_g"], layer["attn_ln_b"])
        # fully fused FFN: gelu(x@w1+b1)@w2 + b2 + residual -> LayerNorm, single kernel
        x2 = ffn_fused(x2, layer["w1"], layer["b1"], layer["w2"], layer["b2"],
                       layer["ffn_ln_g"], layer["ffn_ln_b"])

    last_hidden_state = x2.reshape(B, S, HIDDEN)
    # emb = mean(last_hidden_state, axis=1); output = self.out(self.ln(emb))
    return head(last_hidden_state, params["ln_g"], params["ln_b"],
                params["out_w"], params["out_b"])


if __name__ == "__main__":
    key = jax.random.PRNGKey(0)
    pkey, ikey = jax.random.split(key)
    params = init_params(pkey)

    B, S = 2, 8
    ids = jax.random.randint(ikey, (B, S), 0, VOCAB, dtype=jnp.int32)
    mask = jnp.ones((B, S), dtype=jnp.int32).at[:, -2:].set(0)   # last 2 tokens padded
    token_type_ids = jnp.zeros((B, S), dtype=jnp.int32)

    out = feedback_model_forward(params, ids, mask, token_type_ids)
    out = jax.block_until_ready(out)
    assert out.shape == (B, 3) and out.dtype == jnp.float32
    print("KERNEL_OK")
</pallas_src>

<mosaic_0001>
module attributes {stable_mosaic.version = 11 : i64} {
  func.func @_ln_kernel(%arg0: i32, %arg1: memref<16x1024xf32, #tpu.memory_space<vmem>>, %arg2: memref<1x1024xf32, #tpu.memory_space<vmem>>, %arg3: memref<1x1024xf32, #tpu.memory_space<vmem>>, %arg4: memref<16x1024xf32, #tpu.memory_space<vmem>>) attributes {dimension_semantics = [#tpu.dimension_semantics<parallel>], iteration_bounds = array<i64: 1>, scalar_prefetch = 0 : i64, scratch_operands = 0 : i64, tpu.core_type = #tpu.core_type<tc>, window_params = [{transform_indices = @transform_0, window_bounds = array<i64: 16, 1024>}, {pipeline_mode = #tpu.pipeline_mode<synchronous>, transform_indices = @transform_1, window_bounds = array<i64: 1, 1024>}, {pipeline_mode = #tpu.pipeline_mode<synchronous>, transform_indices = @transform_2, window_bounds = array<i64: 1, 1024>}, {transform_indices = @transform_3, window_bounds = array<i64: 16, 1024>}]} {
    %c0 = arith.constant 0 : index
    %c0_0 = arith.constant 0 : index
    %0 = vector.load %arg1[%c0, %c0_0] : memref<16x1024xf32, #tpu.memory_space<vmem>>, vector<16x1024xf32>
    %cst = arith.constant dense<0.000000e+00> : vector<16xf32>
    %1 = vector.multi_reduction <add>, %0, %cst [1] : vector<16x1024xf32> to vector<16xf32>
    %2 = vector.shape_cast %1 : vector<16xf32> to vector<16x1xf32>
    %cst_1 = arith.constant 1.024000e+03 : f32
    %3 = vector.broadcast %cst_1 : f32 to vector<16x1xf32>
    %4 = arith.divf %2, %3 : vector<16x1xf32>
    %5 = vector.broadcast %4 : vector<16x1xf32> to vector<16x1024xf32>
    %6 = arith.subf %0, %5 : vector<16x1024xf32>
    %7 = arith.mulf %6, %6 : vector<16x1024xf32>
    %cst_2 = arith.constant dense<0.000000e+00> : vector<16xf32>
    %8 = vector.multi_reduction <add>, %7, %cst_2 [1] : vector<16x1024xf32> to vector<16xf32>
    %9 = vector.shape_cast %8 : vector<16xf32> to vector<16x1xf32>
    %cst_3 = arith.constant 1.024000e+03 : f32
    %10 = vector.broadcast %cst_3 : f32 to vector<16x1xf32>
    %11 = arith.divf %9, %10 : vector<16x1xf32>
    %12 = vector.broadcast %4 : vector<16x1xf32> to vector<16x1024xf32>
    %13 = arith.subf %0, %12 : vector<16x1024xf32>
    %cst_4 = arith.constant 9.99999974E-6 : f32
    %14 = vector.broadcast %cst_4 : f32 to vector<16x1xf32>
    %15 = arith.addf %11, %14 : vector<16x1xf32>
    %16 = math.rsqrt %15 : vector<16x1xf32>
    %17 = vector.broadcast %16 : vector<16x1xf32> to vector<16x1024xf32>
    %18 = arith.mulf %13, %17 : vector<16x1024xf32>
    %c0_5 = arith.constant 0 : index
    %c0_6 = arith.constant 0 : index
    %19 = vector.load %arg2[%c0_5, %c0_6] : memref<1x1024xf32, #tpu.memory_space<vmem>>, vector<1x1024xf32>
    %20 = vector.broadcast %19 : vector<1x1024xf32> to vector<16x1024xf32>
    %21 = arith.mulf %18, %20 : vector<16x1024xf32>
    %c0_7 = arith.constant 0 : index
    %c0_8 = arith.constant 0 : index
    %22 = vector.load %arg3[%c0_7, %c0_8] : memref<1x1024xf32, #tpu.memory_space<vmem>>, vector<1x1024xf32>
    %23 = vector.broadcast %22 : vector<1x1024xf32> to vector<16x1024xf32>
    %24 = arith.addf %21, %23 : vector<16x1024xf32>
    %c0_9 = arith.constant 0 : index
    %c0_10 = arith.constant 0 : index
    %25 = vector.load %arg4[%c0_9, %c0_10] : memref<16x1024xf32, #tpu.memory_space<vmem>>, vector<16x1024xf32>
    tpu.vector_store %arg4[%c0_9, %c0_10], %24 {strides = array<i32>} : memref<16x1024xf32, #tpu.memory_space<vmem>>, vector<16x1024xf32>,
    return
  }
  func.func @transform_0(%arg0: i32) -> (i32, i32) {
    %c0_i32 = arith.constant 0 : i32
    %c0_i32_0 = arith.constant 0 : i32
    return %arg0, %c0_i32 : i32, i32
  }
  func.func @transform_1(%arg0: i32) -> (i32, i32) {
    %c0_i32 = arith.constant 0 : i32
    %c0_i32_0 = arith.constant 0 : i32
    %c0_i32_1 = arith.constant 0 : i32
    return %c0_i32, %c0_i32_0 : i32, i32
  }
  func.func @transform_2(%arg0: i32) -> (i32, i32) {
    %c0_i32 = arith.constant 0 : i32
    %c0_i32_0 = arith.constant 0 : i32
    %c0_i32_1 = arith.constant 0 : i32
    return %c0_i32, %c0_i32_0 : i32, i32
  }
  func.func @transform_3(%arg0: i32) -> (i32, i32) {
    %c0_i32 = arith.constant 0 : i32
    %c0_i32_0 = arith.constant 0 : i32
    return %arg0, %c0_i32 : i32, i32
  }
}

</mosaic_0001>

<bundles_post_ra>
// kernel: tpu_custom_call.1
= control target key start
LH: loop header
LB: loop body
LE: loop exit
PB: predicated region body
PF: predicated region fallthrough
CT: control target
= control target key end

     0   :  { %8 = vsyncpa [#allocation3], 0  ;;  %s582_s0 = inlined_call_operand.hbm [shape: f32[16,1024], index: 0, kind: input, shape index: {}]   ;;  %s583_s1 = inlined_call_operand.hbm [shape: f32[1,1024], index: 1, kind: input, shape index: {}]   ;;  %s584_s2 = inlined_call_operand.hbm [shape: f32[1,1024], index: 2, kind: input, shape index: {}]   ;;  %s585_s3 = inlined_call_operand.hbm [shape: f32[16,1024], index: 3, kind: output, shape index: {}]  }
   0x1   :  { %9 = vsyncpa [#allocation6], 0 }
   0x2   :  { %10 = vsyncpa [#allocation4], 0  ;;  %s415_s12 = smov [#allocation5]   ;;  %s416_s14 = smov [#allocation2]  }
   0x3   :  { %s29_s13 = sshll.u32 %s415_s12, 4  ;;  %s16_s15 = sshll.u32 %s416_s14, 4  ;;  %s30_s13 = int_to_ptr.vmem [resolvable:$true] %s29_s13  ;;  %s441_s15 = int_to_ptr.vmem [resolvable:$true] %s16_s15 }
   0x4   :  { %s321_s18 = scalar_lea.hbm %s583_s1, 128 }
   0x5   :  { %p322_p0 = scmp.ne.s32.totalorder %s583_s1, %s321_s18  ;;  %p325_p1 = scmp.lt.u32.totalorder %s321_s18, %s583_s1 }
   0x7   :  { %p327_p2 = pnand %p325_p1, %p322_p0 }
   0x9   :  { %330 = shalt.err (!%p327_p2)
}
   0xa   :  { %s331_s23 = scalar_lea.vmem %s30_s13, 128  ;;  %p336_p4 = scmp.lt.s32.totalorder %s30_s13, %s30_s13 }
   0xb   :  { %p332_p3 = scmp.ne.s32.totalorder %s30_s13, %s331_s23  ;;  %p337_p5 = scmp.lt.s32.totalorder %s331_s23, %s331_s23 }
   0xd   :  { %p338_p6 = por %p337_p5, %p336_p4 }
   0xf   :  { %p339_p7 = pnand %p338_p6, %p332_p3 }
  0x11   :  { %342 = shalt.err (!%p339_p7)
}
  0x12   :  { %32 = dma.hbm_to_vmem [thread:$0]  %s583_s1, 128, %s30_s13, [#allocation6]  }
  0x13   :  { %s343_s28 = scalar_lea.hbm %s582_s0, 2048 }
  0x14   :  { %p344_p8 = scmp.ne.s32.totalorder %s582_s0, %s343_s28  ;;  %p347_p9 = scmp.lt.u32.totalorder %s343_s28, %s582_s0 }
  0x16   :  { %p349_p10 = pnand %p347_p9, %p344_p8 }
  0x18   :  { %352 = shalt.err (!%p349_p10)
}
  0x19   :  { %s353_s6 = scalar_lea.vmem %s441_s15, 2048  ;;  %p358_p12 = scmp.lt.s32.totalorder %s441_s15, %s441_s15 }
  0x1a   :  { %p354_p11 = scmp.ne.s32.totalorder %s441_s15, %s353_s6  ;;  %p359_p13 = scmp.lt.s32.totalorder %s353_s6, %s353_s6 }
  0x1c   :  { %p360_p0 = por %p359_p13, %p358_p12 }
  0x1e   :  { %p361_p1 = pnand %p360_p0, %p354_p11 }
  0x20   :  { %364 = shalt.err (!%p361_p1)
}
  0x21   :  { %s417_s1 = smov 1024   ;;  %s418_s7 = smov 64  }
  0x22   :  { %22 = dma.hbm_to_vmem [thread:$0]  %s582_s0, 2048, %s441_s15, [#allocation3], %s417_s1, %s417_s1, %s418_s7  }
  0x23   :  { %s419_s10 = smov [#allocation7]   ;;  %s365_s14 = scalar_lea.hbm %s584_s2, 128 }
  0x24   :  { %s39_s11 = sshll.u32 %s419_s10, 4  ;;  %p366_p2 = scmp.ne.s32.totalorder %s584_s2, %s365_s14  ;;  %s40_s11 = int_to_ptr.vmem [resolvable:$true] %s39_s11 }
  0x25   :  { %p369_p3 = scmp.lt.u32.totalorder %s365_s14, %s584_s2 }
  0x27   :  { %p371_p4 = pnand %p369_p3, %p366_p2 }
  0x29   :  { %374 = shalt.err (!%p371_p4)
}
  0x2a   :  { %s375_s20 = scalar_lea.vmem %s40_s11, 128  ;;  %p380_p6 = scmp.lt.s32.totalorder %s40_s11, %s40_s11 }
  0x2b   :  { %p376_p5 = scmp.ne.s32.totalorder %s40_s11, %s375_s20  ;;  %p381_p7 = scmp.lt.s32.totalorder %s375_s20, %s375_s20 }
  0x2d   :  { %p382_p8 = por %p381_p7, %p380_p6 }
  0x2f   :  { %p383_p9 = pnand %p382_p8, %p376_p5 }
  0x31   :  { %386 = shalt.err (!%p383_p9)
}
  0x32   :  { %42 = dma.hbm_to_vmem [thread:$0]  %s584_s2, 128, %s40_s11, [#allocation6]  }
  0x33   :  { %409 = dma.done.wait [#allocation3], 2048  }
  0x34   :  { %410 = vsyncadd [#allocation3], 4294965248 }
  0x35   :  { %411 = dma.done.wait [#allocation6], 256  }
  0x36   :  { %412 = vsyncadd [#allocation6], 4294967040  ;;  %v52_v0 = vld [vmem:[#allocation2] sm:$0xff]  ;;  %v53_v1 = vld [vmem:[#allocation2 + $0x8] sm:$0xff]  ;;  %s420_s2 = smov [#allocation8]  }
  0x37   :  { %v54_v2 = vld [vmem:[#allocation2 + $0x10] sm:$0xff]  ;;  %v68_v3 = vadd.f32 %v53_v1, %v52_v0  ;;  %v55_v4 = vld [vmem:[#allocation2 + $0x18] sm:$0xff]  ;;  %v60_v5 = vld [vmem:[#allocation2 + $0x40] sm:$0xff]  ;;  %s298_s21 = sshll.u32 %s420_s2, 4  ;;  %s299_s21 = int_to_ptr.vmem [resolvable:$true] %s298_s21 }
  0x38   :  { %v61_v7 = vld [vmem:[#allocation2 + $0x48] sm:$0xff]  ;;  %v62_v8 = vld [vmem:[#allocation2 + $0x50] sm:$0xff]  ;;  %v56_v9 = vld [vmem:[#allocation2 + $0x20] sm:$0xff]  ;;  %s387_s22 = scalar_lea.vmem %s299_s21, 2048  ;;  %p392_p11 = scmp.lt.s32.totalorder %s299_s21, %s299_s21 }
  0x39   :  { %v69_v6 = vadd.f32 %v68_v3, %v54_v2  ;;  %v77_v10 = vadd.f32 %v61_v7, %v60_v5  ;;  %v63_v12 = vld [vmem:[#allocation2 + $0x58] sm:$0xff]  ;;  %v57_v13 = vld [vmem:[#allocation2 + $0x28] sm:$0xff]  ;;  %v64_v16 = vld [vmem:[#allocation2 + $0x60] sm:$0xff]  ;;  %p388_p10 = scmp.ne.s32.totalorder %s299_s21, %s387_s22  ;;  %p393_p12 = scmp.lt.s32.totalorder %s387_s22, %s387_s22 }
  0x3a   :  { %v58_v17 = vld [vmem:[#allocation2 + $0x30] sm:$0xff]  ;;  %v65_v20 = vld [vmem:[#allocation2 + $0x68] sm:$0xff]  ;;  %v59_v21 = vld [vmem:[#allocation2 + $0x38] sm:$0xff] }
  0x3b   :  { %v70_v11 = vadd.f32 %v69_v6, %v55_v4  ;;  %v78_v14 = vadd.f32 %v77_v10, %v62_v8  ;;  %v66_v24 = vld [vmem:[#allocation2 + $0x70] sm:$0xff]  ;;  %v67_v27 = vld [vmem:[#allocation2 + $0x78] sm:$0xff]  ;;  %p394_p13 = por %p393_p12, %p392_p11 }
  0x3d   :  { %v71_v15 = vadd.f32 %v70_v11, %v56_v9  ;;  %v79_v18 = vadd.f32 %v78_v14, %v63_v12  ;;  %p395_p0 = pnand %p394_p13, %p388_p10 }
  0x3f   :  { %v72_v19 = vadd.f32 %v71_v15, %v57_v13  ;;  %v80_v22 = vadd.f32 %v79_v18, %v64_v16 }
  0x41   :  { %v73_v23 = vadd.f32 %v72_v19, %v58_v17  ;;  %v81_v25 = vadd.f32 %v80_v22, %v65_v20 }
  0x43   :  { %v74_v26 = vadd.f32 %v73_v23, %v59_v21  ;;  %v82_v28 = vadd.f32 %v81_v25, %v66_v24 }
  0x45   :  { %75 = vadd.xlane.f32.xlu0 %v74_v26  ;;  %v83_v29 = vadd.f32 %v82_v28, %v67_v27  ;;  %v161_v28 = vld [vmem:[#allocation5] sm:$0xff] }
  0x49   :  { %84 = vadd.xlane.f32.xlu0 %v83_v29 }
  0xd2   :  { %v76_v30 = vpop.xlane.xlu0 %75 }
  0xd3   :  { %v87_v31 = vmul.f32 0.0009765625, %v76_v30 }
  0xd5   :  { %v487_v32 = vsub.f32 %v52_v0, %v87_v31  ;;  %v489_v33 = vsub.f32 %v53_v1, %v87_v31  ;;  %v491_v34 = vsub.f32 %v54_v2, %v87_v31  ;;  %v493_v37 = vsub.f32 %v55_v4, %v87_v31 }
  0xd6   :  { %v85_v35 = vpop.xlane.xlu0 %84  ;;  %v499_v40 = vsub.f32 %v56_v9, %v87_v31  ;;  %v509_v46 = vsub.f32 %v57_v13, %v87_v31  ;;  %v519_v52 = vsub.f32 %v58_v17, %v87_v31  ;;  %v527_v58 = vsub.f32 %v59_v21, %v87_v31 }
  0xd7   :  { %v88_v36 = vmul.f32 0.0009765625, %v85_v35  ;;  %v105_v38 = vmul.f32 %v487_v32, %v487_v32  ;;  %v106_v39 = vmul.f32 %v489_v33, %v489_v33  ;;  %v107_v41 = vmul.f32 %v491_v34, %v491_v34 }
  0xd8   :  { %v108_v47 = vmul.f32 %v493_v37, %v493_v37  ;;  %v109_v53 = vmul.f32 %v499_v40, %v499_v40  ;;  %v110_v59 = vmul.f32 %v509_v46, %v509_v46  ;;  %v111_v0 = vmul.f32 %v519_v52, %v519_v52 }
  0xd9   :  { %v121_v42 = vadd.f32 %v106_v39, %v105_v38  ;;  %v503_v43 = vsub.f32 %v60_v5, %v88_v36  ;;  %v505_v44 = vsub.f32 %v61_v7, %v88_v36  ;;  %v507_v45 = vsub.f32 %v62_v8, %v88_v36 }
  0xda   :  { %v515_v50 = vsub.f32 %v63_v12, %v88_v36  ;;  %v523_v55 = vsub.f32 %v64_v16, %v88_v36  ;;  %v531_v61 = vsub.f32 %v65_v20, %v88_v36  ;;  %v537_v2 = vsub.f32 %v66_v24, %v88_v36 }
  0xdb   :  { %v122_v48 = vadd.f32 %v121_v42, %v107_v41  ;;  %v113_v49 = vmul.f32 %v503_v43, %v503_v43  ;;  %v114_v51 = vmul.f32 %v505_v44, %v505_v44  ;;  %v115_v56 = vmul.f32 %v507_v45, %v507_v45 }
  0xdc   :  { %v116_v62 = vmul.f32 %v515_v50, %v515_v50  ;;  %v117_v3 = vmul.f32 %v523_v55, %v523_v55  ;;  %v112_v5 = vmul.f32 %v527_v58, %v527_v58  ;;  %v543_v7 = vsub.f32 %v67_v27, %v88_v36  ;;  %v219_v36 = vld [vmem:[#allocation7] sm:$0xff] }
  0xdd   :  { %v123_v54 = vadd.f32 %v122_v48, %v108_v47  ;;  %v130_v57 = vadd.f32 %v114_v51, %v113_v49  ;;  %v118_v8 = vmul.f32 %v531_v61, %v531_v61  ;;  %v119_v11 = vmul.f32 %v537_v2, %v537_v2 }
  0xde   :  { %v120_v13 = vmul.f32 %v543_v7, %v543_v7  ;;  %v163_v16 = vlaneseq }
  0xdf   :  { %v124_v60 = vadd.f32 %v123_v54, %v109_v53  ;;  %v131_v63 = vadd.f32 %v130_v57, %v115_v56 }
  0xe0   :  { %v164_v20 = vshrl.u32 %v163_v16, 7 }
  0xe1   :  { %v125_v1 = vadd.f32 %v124_v60, %v110_v59  ;;  %v132_v4 = vadd.f32 %v131_v63, %v116_v62 }
  0xe2   :  { %v165_v23 = vsub.s32 0, %v164_v20  ;;  %v169_v25 = vsub.s32 1, %v164_v20  ;;  %v173_v26 = vsub.s32 2, %v164_v20  ;;  %v177_v27 = vsub.s32 3, %v164_v20 }
  0xe3   :  { %v126_v6 = vadd.f32 %v125_v1, %v111_v0  ;;  %v133_v9 = vadd.f32 %v132_v4, %v117_v3  ;;  %v181_v29 = vsub.s32 4, %v164_v20  ;;  %v185_v30 = vsub.s32 5, %v164_v20 }
  0xe4   :  { %v189_v31 = vsub.s32 6, %v164_v20  ;;  %v193_v35 = vsub.s32 7, %v164_v20  ;;  %v166_v38 = vrot.slane %v161_v28, %v165_v23  ;;  %v170_v39 = vrot.slane %v161_v28, %v169_v25 }
  0xe5   :  { %v127_v10 = vadd.f32 %v126_v6, %v112_v5  ;;  %v134_v12 = vadd.f32 %v133_v9, %v118_v8  ;;  %v174_v41 = vrot.slane %v161_v28, %v173_v26  ;;  %v178_v42 = vrot.slane %v161_v28, %v177_v27 }
  0xe6   :  { %v182_v47 = vrot.slane %v161_v28, %v181_v29  ;;  %v186_v48 = vrot.slane %v161_v28, %v185_v30  ;;  %v190_v49 = vrot.slane %v161_v28, %v189_v31  ;;  %v194_v51 = vrot.slane %v161_v28, %v193_v35 }
  0xe7   :  { %128 = vadd.xlane.f32.xlu1 %v127_v10  ;;  %v135_v14 = vadd.f32 %v134_v12, %v119_v11  ;;  %v224_v53 = vrot.slane %v219_v36, %v165_v23  ;;  %v228_v54 = vrot.slane %v219_v36, %v169_v25  ;;  %v232_v56 = vrot.slane %v219_v36, %v173_v26 }
  0xe8   :  { %v236_v57 = vrot.slane %v219_v36, %v177_v27  ;;  %v240_v60 = vrot.slane %v219_v36, %v181_v29  ;;  %v244_v62 = vrot.slane %v219_v36, %v185_v30  ;;  %v248_v63 = vrot.slane %v219_v36, %v189_v31 }
  0xe9   :  { %v136_v15 = vadd.f32 %v135_v14, %v120_v13  ;;  %v252_v0 = vrot.slane %v219_v36, %v193_v35 }
  0xeb   :  { %137 = vadd.xlane.f32.xlu1 %v136_v15 }
 0x174   :  { %v129_v17 = vpop.xlane.xlu1 %128 }
 0x175   :  { %v139_v18 = vmul.f32 0.0009765625, %v129_v17 }
 0x177   :  { %v141_v19 = vadd.f32 1e-05, %v139_v18 }
 0x178   :  { %v138_v21 = vpop.xlane.xlu1 %137 }
 0x179   :  { %317 = vrsqrt.f32 %v141_v19  ;;  %v140_v22 = vmul.f32 0.0009765625, %v138_v21 }
 0x17b   :  { %v142_v24 = vadd.f32 1e-05, %v140_v22 }
 0x17d   :  { %319 = vrsqrt.f32 %v142_v24 }
 0x183   :  { %v318_v59 = vpop.eup %317 }
 0x184   :  { %v145_v1 = vmul.f32 %v318_v59, %v487_v32  ;;  %v146_v3 = vmul.f32 %v318_v59, %v489_v33  ;;  %v147_v4 = vmul.f32 %v318_v59, %v491_v34  ;;  %v148_v5 = vmul.f32 %v318_v59, %v493_v37 }
 0x185   :  { %v149_v6 = vmul.f32 %v318_v59, %v499_v40  ;;  %v150_v8 = vmul.f32 %v318_v59, %v509_v46  ;;  %v151_v9 = vmul.f32 %v318_v59, %v519_v52  ;;  %v152_v10 = vmul.f32 %v318_v59, %v527_v58 }
 0x186   :  { %v203_v11 = vmul.f32 %v166_v38, %v145_v1  ;;  %v204_v12 = vmul.f32 %v170_v39, %v146_v3  ;;  %v205_v13 = vmul.f32 %v174_v41, %v147_v4  ;;  %v206_v14 = vmul.f32 %v178_v42, %v148_v5 }
 0x187   :  { %v207_v15 = vmul.f32 %v182_v47, %v149_v6  ;;  %v208_v32 = vmul.f32 %v186_v48, %v150_v8  ;;  %v209_v16 = vmul.f32 %v190_v49, %v151_v9  ;;  %v210_v33 = vmul.f32 %v194_v51, %v152_v10  ;;  %v320_v17 = vpop.eup %319 }
 0x188   :  { %v261_v34 = vadd.f32 %v224_v53, %v203_v11  ;;  %v262_v18 = vadd.f32 %v228_v54, %v204_v12  ;;  %v263_v37 = vadd.f32 %v232_v56, %v205_v13  ;;  %v264_v19 = vadd.f32 %v236_v57, %v206_v14 }
 0x189   :  { %v153_v40 = vmul.f32 %v320_v17, %v503_v43  ;;  %v154_v46 = vmul.f32 %v320_v17, %v505_v44  ;;  %v155_v52 = vmul.f32 %v320_v17, %v507_v45  ;;  %v156_v58 = vmul.f32 %v320_v17, %v515_v50 }
 0x18a   :  { %v157_v20 = vmul.f32 %v320_v17, %v523_v55  ;;  %v158_v21 = vmul.f32 %v320_v17, %v531_v61  ;;  %v159_v22 = vmul.f32 %v320_v17, %v537_v2  ;;  %v160_v23 = vmul.f32 %v320_v17, %v543_v7  ;;  %277 = vst [vmem:[#allocation8] sm:$0xff] %v261_v34 }
 0x18b   :  { %278 = vst [vmem:[#allocation8 + $0x8] sm:$0xff] %v262_v18  ;;  %279 = vst [vmem:[#allocation8 + $0x10] sm:$0xff] %v263_v37  ;;  %v211_v24 = vmul.f32 %v166_v38, %v153_v40  ;;  %v212_v43 = vmul.f32 %v170_v39, %v154_v46  ;;  %v213_v25 = vmul.f32 %v174_v41, %v155_v52 }
 0x18c   :  { %280 = vst [vmem:[#allocation8 + $0x18] sm:$0xff] %v264_v19  ;;  %v214_v44 = vmul.f32 %v178_v42, %v156_v58  ;;  %v215_v26 = vmul.f32 %v182_v47, %v157_v20  ;;  %v216_v45 = vmul.f32 %v186_v48, %v158_v21  ;;  %v217_v27 = vmul.f32 %v190_v49, %v159_v22 }
 0x18d   :  { %v218_v50 = vmul.f32 %v194_v51, %v160_v23  ;;  %v265_v55 = vadd.f32 %v240_v60, %v207_v15  ;;  %v266_v61 = vadd.f32 %v244_v62, %v208_v32  ;;  %v267_v28 = vadd.f32 %v248_v63, %v209_v16 }
 0x18e   :  { %v268_v2 = vadd.f32 %v252_v0, %v210_v33  ;;  %v269_v29 = vadd.f32 %v224_v53, %v211_v24  ;;  %v270_v7 = vadd.f32 %v228_v54, %v212_v43  ;;  %v271_v30 = vadd.f32 %v232_v56, %v213_v25 }
 0x18f   :  { %v272_v31 = vadd.f32 %v236_v57, %v214_v44  ;;  %v273_v35 = vadd.f32 %v240_v60, %v215_v26  ;;  %v274_v36 = vadd.f32 %v244_v62, %v216_v45  ;;  %v275_v38 = vadd.f32 %v248_v63, %v217_v27  ;;  %281 = vst [vmem:[#allocation8 + $0x20] sm:$0xff] %v265_v55 }
 0x190   :  { %v276_v39 = vadd.f32 %v252_v0, %v218_v50  ;;  %282 = vst [vmem:[#allocation8 + $0x28] sm:$0xff] %v266_v61  ;;  %283 = vst [vmem:[#allocation8 + $0x30] sm:$0xff] %v267_v28 }
 0x191   :  { %284 = vst [vmem:[#allocation8 + $0x38] sm:$0xff] %v268_v2  ;;  %285 = vst [vmem:[#allocation8 + $0x40] sm:$0xff] %v269_v29 }
 0x192   :  { %286 = vst [vmem:[#allocation8 + $0x48] sm:$0xff] %v270_v7  ;;  %287 = vst [vmem:[#allocation8 + $0x50] sm:$0xff] %v271_v30 }
 0x193   :  { %288 = vst [vmem:[#allocation8 + $0x58] sm:$0xff] %v272_v31  ;;  %289 = vst [vmem:[#allocation8 + $0x60] sm:$0xff] %v273_v35 }
 0x194   :  { %290 = vst [vmem:[#allocation8 + $0x68] sm:$0xff] %v274_v36  ;;  %291 = vst [vmem:[#allocation8 + $0x70] sm:$0xff] %v275_v38 }
 0x195   :  { %292 = vst [vmem:[#allocation8 + $0x78] sm:$0xff] %v276_v39 }
 0x196   :  { %398 = shalt.err (!%p395_p0)
}
 0x197   :  { %s399_s25 = scalar_lea.hbm %s585_s3, 2048 }
 0x198   :  { %p400_p1 = scmp.ne.s32.totalorder %s585_s3, %s399_s25  ;;  %p403_p2 = scmp.lt.u32.totalorder %s399_s25, %s585_s3 }
 0x19a   :  { %p405_p3 = pnand %p403_p2, %p400_p1 }
 0x19c   :  { %408 = shalt.err (!%p405_p3)
}
 0x19d   :  { %304 = dma.vmem_to_hbm [thread:$0]  %s299_s21, 2048, %s585_s3, [#allocation4], %s417_s1, %s417_s1, %s418_s7  }
 0x19e   :  { %413 = dma.done.wait [#allocation4], 2048  }
 0x19f   :  { %414 = vsyncadd [#allocation4], 4294965248 }
 0x1a0   :  { %308 = vsyncpa [#allocation3], 1 }
 0x1a1   :  { %309 = vsyncpa [#allocation6], 1 }
 0x1a2   :  { %310 = vsyncpa [#allocation4], 1 }

</bundles_post_ra>
